<compile_context>
chip_gen: v6e
topology: v6e:2x2x1
jax: 0.10.0
libtpu: 0.0.40
codegen_flags: <defaults>
</compile_context>

<pallas_src>
import jax
import jax.numpy as jnp
from jax.experimental import pallas as pl
from jax.experimental.pallas import tpu as pltpu


def _round_up(x, m):
    return ((x + m - 1) // m) * m


def _generator_kernel(z_ref, w1_ref, b1_ref, w2_ref, b2_ref, w3_ref, b3_ref,
                      o_ref):
    # Layer 1: Linear(latent_dim, H1) + ReLU   (f32 accumulate, f32 epilogue)
    h1 = jnp.dot(z_ref[...], w1_ref[...], preferred_element_type=jnp.float32)
    h1 = jnp.maximum(h1 + b1_ref[...], 0.0)
    # Layer 2: Linear(H1, H2) + ReLU
    h2 = jnp.dot(h1.astype(w2_ref.dtype), w2_ref[...],
                 preferred_element_type=jnp.float32)
    h2 = jnp.maximum(h2 + b2_ref[...], 0.0)
    # Layer 3: Linear(H2, O) + Tanh
    h3 = jnp.dot(h2.astype(w3_ref.dtype), w3_ref[...],
                 preferred_element_type=jnp.float32)
    o_ref[...] = jnp.tanh(h3 + b3_ref[...]).astype(o_ref.dtype)


def generator_forward(z, params, *, tile_b=256, use_bf16=True):
    """Fused 3-layer MLP generator.

    z: (B, latent_dim) float32
    params: dict with w1 (L,64), b1 (1,64), w2 (64,128), b2 (1,128),
            w3 (128,O), b3 (1,O)   (weights stored (in, out))
    """
    w1, b1, w2, b2, w3, b3 = (params["w1"], params["b1"], params["w2"],
                              params["b2"], params["w3"], params["b3"])
    B, L = z.shape
    H1 = w1.shape[1]
    H2 = w2.shape[1]
    O = w3.shape[1]

    compute_dtype = jnp.bfloat16 if use_bf16 else jnp.float32

    # --- lane-dense padding of hidden / output widths (exact: zeros) -------
    H1p = _round_up(H1, 128)
    H2p = _round_up(H2, 128)
    Op = _round_up(O, 128)

    w1p = jnp.zeros((L, H1p), compute_dtype).at[:, :H1].set(
        w1.astype(compute_dtype))
    b1p = jnp.zeros((1, H1p), jnp.float32).at[:, :H1].set(b1)
    w2p = jnp.zeros((H1p, H2p), compute_dtype).at[:H1, :H2].set(
        w2.astype(compute_dtype))
    b2p = jnp.zeros((1, H2p), jnp.float32).at[:, :H2].set(b2)
    w3p = jnp.zeros((H2p, Op), compute_dtype).at[:H2, :O].set(
        w3.astype(compute_dtype))
    b3p = jnp.zeros((1, Op), jnp.float32).at[:, :O].set(b3)

    # --- batch tiling: cap tile so the grid has >= 2 steps (v7x megacore),
    #     keep it a multiple of 8 (sublane), pad ragged batches with zeros ---
    half_b = -(-B // 2)                      # ceil(B / 2)
    tile_b = max(8, min(tile_b, _round_up(half_b, 8)))
    grid_b = pl.cdiv(B, tile_b)
    B_pad = grid_b * tile_b

    z_p = z.astype(compute_dtype)
    if B_pad != B:
        z_p = jnp.pad(z_p, ((0, B_pad - B), (0, 0)))

    in_specs = [
        pl.BlockSpec((tile_b, L), lambda i: (i, 0)),    # z: tiled over batch
        pl.BlockSpec((L, H1p), lambda i: (0, 0)),       # weights/biases:
        pl.BlockSpec((1, H1p), lambda i: (0, 0)),       # same full block every
        pl.BlockSpec((H1p, H2p), lambda i: (0, 0)),     # grid step (tiny, VMEM
        pl.BlockSpec((1, H2p), lambda i: (0, 0)),       # resident)
        pl.BlockSpec((H2p, Op), lambda i: (0, 0)),
        pl.BlockSpec((1, Op), lambda i: (0, 0)),
    ]
    out_specs = pl.BlockSpec((tile_b, Op), lambda i: (i, 0))

    out_padded = pl.pallas_call(
        _generator_kernel,
        out_shape=jax.ShapeDtypeStruct((B_pad, Op), jnp.float32),
        grid_spec=pltpu.PrefetchScalarGridSpec(
            num_scalar_prefetch=0,
            grid=(grid_b,),
            in_specs=in_specs,
            out_specs=out_specs,
        ),
        compiler_params=pltpu.CompilerParams(
            dimension_semantics=("parallel",)),
    )(z_p, w1p, b1p, w2p, b2p, w3p, b3p)

    return out_padded[:B, :O]


def init_generator_params(key, latent_dim, output_dim):
    """PyTorch-style uniform(+/- 1/sqrt(fan_in)) init, weights (in, out)."""
    dims = [(latent_dim, 64), (64, 128), (128, output_dim)]
    params = {}
    for idx, (fan_in, fan_out) in enumerate(dims, start=1):
        key, kw, kb = jax.random.split(key, 3)
        bound = 1.0 / jnp.sqrt(fan_in)
        params[f"w{idx}"] = jax.random.uniform(
            kw, (fan_in, fan_out), jnp.float32, -bound, bound)
        params[f"b{idx}"] = jax.random.uniform(
            kb, (1, fan_out), jnp.float32, -bound, bound)
    return params


def generator_reference(z, params):
    """Pure-JAX f32 reference for correctness checking."""
    h = jnp.maximum(z @ params["w1"] + params["b1"], 0.0)
    h = jnp.maximum(h @ params["w2"] + params["b2"], 0.0)
    return jnp.tanh(h @ params["w3"] + params["b3"])


if __name__ == "__main__":
    latent_dim = 32
    output_dim = 16
    batch = 12  # deliberately ragged (not a multiple of the tile)

    key = jax.random.PRNGKey(0)
    key, kz = jax.random.split(key)
    z = jax.random.normal(kz, (batch, latent_dim), dtype=jnp.float32)
    params = init_generator_params(key, latent_dim, output_dim)

    ref = generator_reference(z, params)

    # f32 path: exact match vs reference.
    out_f32 = jax.block_until_ready(
        generator_forward(z, params, use_bf16=False))
    assert out_f32.shape == (batch, output_dim)
    assert jnp.allclose(out_f32, ref, atol=1e-5, rtol=1e-5), \
        "f32 kernel mismatch vs reference"

    # bf16-operand / f32-accumulate path (default, for v6e/v7x MXU).
    out_bf16 = jax.block_until_ready(
        generator_forward(z, params, use_bf16=True))
    assert out_bf16.shape == (batch, output_dim)
    assert jnp.allclose(out_bf16, ref, atol=3e-2, rtol=3e-2), \
        "bf16 kernel mismatch vs reference"

    print("KERNEL_OK")
</pallas_src>

<mosaic_0001>
module attributes {stable_mosaic.version = 11 : i64} {
  func.func @_generator_kernel(%arg0: i32, %arg1: memref<8x32xf32, #tpu.memory_space<vmem>>, %arg2: memref<32x128xf32, #tpu.memory_space<vmem>>, %arg3: memref<1x128xf32, #tpu.memory_space<vmem>>, %arg4: memref<128x128xf32, #tpu.memory_space<vmem>>, %arg5: memref<1x128xf32, #tpu.memory_space<vmem>>, %arg6: memref<128x128xf32, #tpu.memory_space<vmem>>, %arg7: memref<1x128xf32, #tpu.memory_space<vmem>>, %arg8: memref<8x128xf32, #tpu.memory_space<vmem>>) attributes {dimension_semantics = [#tpu.dimension_semantics<parallel>], iteration_bounds = array<i64: 2>, scalar_prefetch = 0 : i64, scratch_operands = 0 : i64, tpu.core_type = #tpu.core_type<tc>, window_params = [{transform_indices = @transform_0, window_bounds = array<i64: 8, 32>}, {pipeline_mode = #tpu.pipeline_mode<synchronous>, transform_indices = @transform_1, window_bounds = array<i64: 32, 128>}, {pipeline_mode = #tpu.pipeline_mode<synchronous>, transform_indices = @transform_2, window_bounds = array<i64: 1, 128>}, {pipeline_mode = #tpu.pipeline_mode<synchronous>, transform_indices = @transform_3, window_bounds = array<i64: 128, 128>}, {pipeline_mode = #tpu.pipeline_mode<synchronous>, transform_indices = @transform_4, window_bounds = array<i64: 1, 128>}, {pipeline_mode = #tpu.pipeline_mode<synchronous>, transform_indices = @transform_5, window_bounds = array<i64: 128, 128>}, {pipeline_mode = #tpu.pipeline_mode<synchronous>, transform_indices = @transform_6, window_bounds = array<i64: 1, 128>}, {transform_indices = @transform_7, window_bounds = array<i64: 8, 128>}]} {
    %c0 = arith.constant 0 : index
    %c0_0 = arith.constant 0 : index
    %0 = vector.load %arg1[%c0, %c0_0] : memref<8x32xf32, #tpu.memory_space<vmem>>, vector<8x32xf32>
    %c0_1 = arith.constant 0 : index
    %c0_2 = arith.constant 0 : index
    %1 = vector.load %arg2[%c0_1, %c0_2] : memref<32x128xf32, #tpu.memory_space<vmem>>, vector<32x128xf32>
    %cst = arith.constant dense<0.000000e+00> : vector<8x128xf32>
    %2 = tpu.matmul %0, %1, %cst {dimension_numbers = #tpu.dot_dimension_numbers<[1], [0], [0], [1], [0, 0, 1, 1], [], []>} : vector<8x32xf32>, vector<32x128xf32>, vector<8x128xf32> -> vector<8x128xf32>
    %c0_3 = arith.constant 0 : index
    %c0_4 = arith.constant 0 : index
    %3 = vector.load %arg3[%c0_3, %c0_4] : memref<1x128xf32, #tpu.memory_space<vmem>>, vector<1x128xf32>
    %4 = vector.broadcast %3 : vector<1x128xf32> to vector<8x128xf32>
    %5 = arith.addf %2, %4 : vector<8x128xf32>
    %cst_5 = arith.constant 0.000000e+00 : f32
    %6 = vector.broadcast %cst_5 : f32 to vector<8x128xf32>
    %7 = arith.maximumf %5, %6 : vector<8x128xf32>
    %c0_6 = arith.constant 0 : index
    %c0_7 = arith.constant 0 : index
    %8 = vector.load %arg4[%c0_6, %c0_7] : memref<128x128xf32, #tpu.memory_space<vmem>>, vector<128x128xf32>
    %cst_8 = arith.constant dense<0.000000e+00> : vector<8x128xf32>
    %9 = tpu.matmul %7, %8, %cst_8 {dimension_numbers = #tpu.dot_dimension_numbers<[1], [0], [0], [1], [0, 0, 1, 1], [], []>} : vector<8x128xf32>, vector<128x128xf32>, vector<8x128xf32> -> vector<8x128xf32>
    %c0_9 = arith.constant 0 : index
    %c0_10 = arith.constant 0 : index
    %10 = vector.load %arg5[%c0_9, %c0_10] : memref<1x128xf32, #tpu.memory_space<vmem>>, vector<1x128xf32>
    %11 = vector.broadcast %10 : vector<1x128xf32> to vector<8x128xf32>
    %12 = arith.addf %9, %11 : vector<8x128xf32>
    %cst_11 = arith.constant 0.000000e+00 : f32
    %13 = vector.broadcast %cst_11 : f32 to vector<8x128xf32>
    %14 = arith.maximumf %12, %13 : vector<8x128xf32>
    %c0_12 = arith.constant 0 : index
    %c0_13 = arith.constant 0 : index
    %15 = vector.load %arg6[%c0_12, %c0_13] : memref<128x128xf32, #tpu.memory_space<vmem>>, vector<128x128xf32>
    %cst_14 = arith.constant dense<0.000000e+00> : vector<8x128xf32>
    %16 = tpu.matmul %14, %15, %cst_14 {dimension_numbers = #tpu.dot_dimension_numbers<[1], [0], [0], [1], [0, 0, 1, 1], [], []>} : vector<8x128xf32>, vector<128x128xf32>, vector<8x128xf32> -> vector<8x128xf32>
    %c0_15 = arith.constant 0 : index
    %c0_16 = arith.constant 0 : index
    %17 = vector.load %arg7[%c0_15, %c0_16] : memref<1x128xf32, #tpu.memory_space<vmem>>, vector<1x128xf32>
    %18 = vector.broadcast %17 : vector<1x128xf32> to vector<8x128xf32>
    %19 = arith.addf %16, %18 : vector<8x128xf32>
    %20 = math.tanh %19 : vector<8x128xf32>
    %c0_17 = arith.constant 0 : index
    %c0_18 = arith.constant 0 : index
    %21 = vector.load %arg8[%c0_17, %c0_18] : memref<8x128xf32, #tpu.memory_space<vmem>>, vector<8x128xf32>
    tpu.vector_store %arg8[%c0_17, %c0_18], %20 {strides = array<i32>} : memref<8x128xf32, #tpu.memory_space<vmem>>, vector<8x128xf32>,
    return
  }
  func.func @transform_0(%arg0: i32) -> (i32, i32) {
    %c0_i32 = arith.constant 0 : i32
    %c0_i32_0 = arith.constant 0 : i32
    return %arg0, %c0_i32 : i32, i32
  }
  func.func @transform_1(%arg0: i32) -> (i32, i32) {
    %c0_i32 = arith.constant 0 : i32
    %c0_i32_0 = arith.constant 0 : i32
    %c0_i32_1 = arith.constant 0 : i32
    return %c0_i32, %c0_i32_0 : i32, i32
  }
  func.func @transform_2(%arg0: i32) -> (i32, i32) {
    %c0_i32 = arith.constant 0 : i32
    %c0_i32_0 = arith.constant 0 : i32
    %c0_i32_1 = arith.constant 0 : i32
    return %c0_i32, %c0_i32_0 : i32, i32
  }
  func.func @transform_3(%arg0: i32) -> (i32, i32) {
    %c0_i32 = arith.constant 0 : i32
    %c0_i32_0 = arith.constant 0 : i32
    %c0_i32_1 = arith.constant 0 : i32
    return %c0_i32, %c0_i32_0 : i32, i32
  }
  func.func @transform_4(%arg0: i32) -> (i32, i32) {
    %c0_i32 = arith.constant 0 : i32
    %c0_i32_0 = arith.constant 0 : i32
    %c0_i32_1 = arith.constant 0 : i32
    return %c0_i32, %c0_i32_0 : i32, i32
  }
  func.func @transform_5(%arg0: i32) -> (i32, i32) {
    %c0_i32 = arith.constant 0 : i32
    %c0_i32_0 = arith.constant 0 : i32
    %c0_i32_1 = arith.constant 0 : i32
    return %c0_i32, %c0_i32_0 : i32, i32
  }
  func.func @transform_6(%arg0: i32) -> (i32, i32) {
    %c0_i32 = arith.constant 0 : i32
    %c0_i32_0 = arith.constant 0 : i32
    %c0_i32_1 = arith.constant 0 : i32
    return %c0_i32, %c0_i32_0 : i32, i32
  }
  func.func @transform_7(%arg0: i32) -> (i32, i32) {
    %c0_i32 = arith.constant 0 : i32
    %c0_i32_0 = arith.constant 0 : i32
    return %arg0, %c0_i32 : i32, i32
  }
}

</mosaic_0001>

<bundles_post_ra>
// kernel: tpu_custom_call.1
= control target key start
LH: loop header
LB: loop body
LE: loop exit
PB: predicated region body
PF: predicated region fallthrough
CT: control target
= control target key end

     0   :  { %s1419_s0 = inlined_call_operand.hbm [shape: f32[16,32], index: 0, kind: input, shape index: {}]   ;;  %s1420_s1 = inlined_call_operand.hbm [shape: f32[32,128], index: 1, kind: input, shape index: {}]   ;;  %s1421_s2 = inlined_call_operand.vmem [shape: f32[1,128], index: 2, kind: input, shape index: {}]   ;;  %s1422_s3 = inlined_call_operand.hbm [shape: f32[128,128], index: 3, kind: input, shape index: {}]   ;;  %s1423_s4 = inlined_call_operand.vmem [shape: f32[1,128], index: 4, kind: input, shape index: {}]   ;;  %s1424_s5 = inlined_call_operand.hbm [shape: f32[128,128], index: 5, kind: input, shape index: {}]   ;;  %s1425_s6 = inlined_call_operand.vmem [shape: f32[1,128], index: 6, kind: input, shape index: {}]   ;;  %s1426_s7 = inlined_call_operand.hbm [shape: f32[16,128], index: 7, kind: output, shape index: {}]  }
   0x1   :  { %1431 = sst [smem:[#allocation15_spill]] %s1420_s1 }
   0x2   :  { %1432 = sst [smem:[#allocation16_spill]] %s1422_s3 }
   0x3   :  { %12 = vsyncpa [#allocation3], 0 }
   0x4   :  { %14 = vsyncpa [#allocation3 + $0x1], 0 }
   0x5   :  { %15 = vsyncpa [#allocation6], 0 }
   0x6   :  { %16 = vsyncpa [#allocation9], 0 }
   0x7   :  { %17 = vsyncpa [#allocation4], 0 }
   0x8   :  { %19 = vsyncpa [#allocation4 + $0x1], 0  ;;  %s1181_s24 = smov 0   ;;  %s1183_s25 = smov 0  }
   0x9   :  { %s1185_s26 = smov 0   ;;  %s1187_s27 = smov 0  }
   0xa LB: > { %s1202_s28 = sadd.s32 4294967295, %s1130_s27   ;;  %s727_s29 = sadd.s32 4294967294, %s1130_s27   ;;  %s1130_s27 = sphi %s1187_s27, %s1454_s27   ;;  %s1126_s26 = sphi %s1185_s26, %s1453_s26   ;;  %s1122_s25 = sphi %s1183_s25, %s1452_s25   ;;  %s1118_s24 = sphi %s1181_s24, %s1451_s24  }
   0xb   : > { %p45_p0 = scmp.ne.s32.totalorder %s1122_s25, %s1118_s24  ;;  %p1427_p1 = scmp.eq.s32.totalorder %s1202_s28, 0 }
   0xc   : > { %p201_p3 = scmp.eq.s32.totalorder %s727_s29, 1  ;;  %p728_p5 = scmp.ge.s32.totalorder %s1130_s27, 1 }
   0xd   : > { %p1211_p4 = por %p1427_p1, %p45_p0  ;;  %p208_p7 = scmp.lt.s32.totalorder %s1130_s27, 3 }
   0xe   : > { %p1216_p6 = por %p201_p3, %p45_p0  ;;  %s1132_s10 = smov [#allocation5]  }
   0xf   : > { %s1433_s30 = scalar_select %p1211_p4, 1, 0 }
  0x10   : > { %s1434_s8 = scalar_select %p1216_p6, 1, 0 }
  0x11   : > { %p1221_p8 = pnand %p728_p5, %p208_p7  ;;  %s220_s11 = sshll.u32 %s1132_s10, 4  ;;  %s221_s11 = int_to_ptr.vmem [resolvable:$true] %s220_s11 }
  0x12   : > { %s1133_s13 = smov [#allocation7]   ;;  %s1134_s15 = smov [#allocation8]  }
  0x13   : > { %s1435_s9 = scalar_select %p1221_p8, 1, 0 }
  0x14   : > { %p885_p9 = pneg %p1221_p8  ;;  %s236_s14 = sshll.u32 %s1133_s13, 4  ;;  %s237_s14 = int_to_ptr.vmem [resolvable:$true] %s236_s14 }
  0x15   : > { %s252_s16 = sshll.u32 %s1134_s15, 4  ;;  %s963_s17 = scalar_lea.vmem %s221_s11, 512  ;;  %s253_s16 = int_to_ptr.vmem [resolvable:$true] %s252_s16 }
  0x16   : > { %p1230_p11 = pnand %p885_p9, %p1427_p1  ;;  %p964_p13 = scmp.ne.s32.totalorder %s221_s11, %s963_s17 }
  0x17   : > { %p971_p5 = scmp.lt.s32.totalorder %s221_s11, %s221_s11  ;;  %p972_p7 = scmp.lt.s32.totalorder %s963_s17, %s963_s17 }
  0x18   : > { %p954_p12 = pneg %p1230_p11 }
  0x19   : > { %p973_p9 = por %p972_p7, %p971_p5 }
  0x1a   : > { %p966_p0 = pnand %p964_p13, %p954_p12 }
  0x1c   : > { %p967_p3 = pneg %p966_p0 }
  0x1e   : > { %p974_p10 = pnand %p973_p9, %p967_p3 }
  0x20   : > { %977 = shalt.err (!%p974_p10)
}
  0x21   : > { %s1135_s18 = smov 128   ;;  %s1136_s19 = smov 8  }
  0x22   : > { %s1437_s1 = sld [smem:[#allocation15_spill]]  ;;  %s989_s22 = scalar_lea.vmem %s237_s14, 2048 }
  0x23   : > { %p990_p1 = scmp.ne.s32.totalorder %s237_s14, %s989_s22  ;;  %p997_p2 = scmp.lt.s32.totalorder %s237_s14, %s237_s14 }
  0x24   : > { %p998_p6 = scmp.lt.s32.totalorder %s989_s22, %s989_s22 }
  0x25   : > { %p992_p13 = pnand %p990_p1, %p954_p12 }
  0x26   : > { %p999_p5 = por %p998_p6, %p997_p2 }
  0x27   : > { %p993_p0 = pneg %p992_p13 }
  0x28   : > { %888 = dma.hbm_to_vmem [thread:$0]  (!%p1230_p11), %s1437_s1, 512, %s221_s11, [#allocation6], %s1135_s18, %s1135_s18, %s1136_s19  }
  0x29   : > { %p1000_p3 = pnand %p999_p5, %p993_p0 }
  0x2b   : > { %1003 = shalt.err (!%p1000_p3)
}
  0x2c   : > { %s1438_s3 = sld [smem:[#allocation16_spill]]  ;;  %s1015_s10 = scalar_lea.vmem %s253_s16, 2048 }
  0x2d   : > { %p1016_p10 = scmp.ne.s32.totalorder %s253_s16, %s1015_s10  ;;  %p1023_p9 = scmp.lt.s32.totalorder %s253_s16, %s253_s16 }
  0x2e   : > { %p1024_p13 = scmp.lt.s32.totalorder %s1015_s10, %s1015_s10 }
  0x2f   : > { %p1018_p7 = pnand %p1016_p10, %p954_p12 }
  0x30   : > { %p1025_p4 = por %p1024_p13, %p1023_p9 }
  0x31   : > { %p1019_p1 = pneg %p1018_p7 }
  0x32   : > { %891 = dma.hbm_to_vmem [thread:$0]  (!%p1230_p11), %s1438_s3, 2048, %s237_s14, [#allocation6], %s1135_s18, %s1135_s18, %s1136_s19  }
  0x33   : > { %p1026_p2 = pnand %p1025_p4, %p1019_p1 }
  0x35   : > { %1029 = shalt.err (!%p1026_p2)
}
  0x36   : > { %894 = dma.hbm_to_vmem [thread:$0]  (!%p1230_p11), %s1424_s5, 2048, %s253_s16, [#allocation9], %s1135_s18, %s1135_s18, %s1136_s19  }
  0x37   : > { %s1261_s14 = sadd.s32 1, %s1130_s27   ;;  %s32_s12 = sadd.s32 1, %s1126_s26 }
  0x38   : > { %s29_s15 = ssub.s32 %s1130_s27, %s1261_s14  ;;  %p39_p6 = scmp.ne.s32.totalorder %s1126_s26, %s1122_s25 }
  0x39   : > { %p30_p4 = scmp.eq.s32.totalorder %s29_s15, 0  ;;  %p40_p12 = scmp.eq.s32.totalorder %s1130_s27, 0 }
  0x3a   : > { %p906_p0 = scmp.lt.s32.totalorder %s1130_s27, 2  ;;  %p1439_p3 = scmp.eq.s32.totalorder %s1202_s28, 1 }
  0x3b   : > { %s1271_s17 = scalar_select %p30_p4, %s1126_s26, %s32_s12  }
  0x3c   : > { %p41_p5 = por %p40_p12, %p39_p6  ;;  %p1275_p10 = por %p1439_p3, %p39_p6 }
  0x3d   : > { %s269_s21 = sand.u32 1, %s1126_s26   ;;  %s734_s22 = sshll.u32 %s1130_s27, 7 }
  0x3e   : > { %s1440_s20 = scalar_select %p1275_p10, 1, 0 }
  0x3f   : > { %s733_s16 = sshll.u32 %s269_s21, 3  ;;  %s1284_s23 = scalar_lea.hbm %s1419_s0, %s734_s22 }
  0x40   : > { %s273_s29 = scalar_lea.vmem [#allocation2], %s733_s16  ;;  %p1286_p11 = pnand %p906_p0, %p41_p5 }
  0x41   : > { %s280_s10 = sshll.u32 %s273_s29, 4  ;;  %s270_s13 = scalar_lea.sflag [#allocation3], %s269_s21  ;;  %s281_s10 = int_to_ptr.vmem [resolvable:$true] %s280_s10 }
  0x42   : > { %s1030_s15 = scalar_lea.hbm %s1284_s23, 128  ;;  %p1032_p1 = pneg %p1286_p11 }
  0x43   : > { %p1031_p7 = scmp.ne.s32.totalorder %s1284_s23, %s1030_s15  ;;  %s1035_s18 = scalar_lea.hbm %s1419_s0, 256 }
  0x44   : > { %p1036_p2 = scmp.lt.s32.totalorder %s1284_s23, %s1419_s0  ;;  %p1037_p4 = scmp.lt.s32.totalorder %s1035_s18, %s1030_s15 }
  0x45   : > { %p1033_p9 = pnand %p1032_p1, %p1031_p7 }
  0x46   : > { %p1038_p6 = por %p1037_p4, %p1036_p2 }
  0x47   : > { %p1034_p13 = pneg %p1033_p9 }
  0x49   : > { %p1039_p12 = pnand %p1038_p6, %p1034_p13 }
  0x4b   : > { %1042 = shalt.err (!%p1039_p12)
}
  0x4c   : > { %s1043_s29 = scalar_lea.vmem %s281_s10, 128  ;;  %s1137_s21 = smov [#allocation2]  }
  0x4d   : > { %p1044_p0 = scmp.ne.s32.totalorder %s281_s10, %s1043_s29  ;;  %s1048_s1 = sshll.u32 %s1137_s21, 4  ;;  %s1049_s1 = int_to_ptr.vmem [resolvable:$false] %s1048_s1 }
  0x4e   : > { %s1050_s3 = scalar_lea.vmem %s1049_s1, 256  ;;  %p1051_p7 = scmp.lt.s32.totalorder %s281_s10, %s1049_s1 }
  0x4f   : > { %p1046_p5 = pnand %p1044_p0, %p1032_p1  ;;  %p1052_p9 = scmp.lt.s32.totalorder %s1050_s3, %s1043_s29 }
  0x51   : > { %p1047_p3 = pneg %p1046_p5  ;;  %p1053_p10 = por %p1052_p9, %p1051_p7 }
  0x53   : > { %p1054_p8 = pnand %p1053_p10, %p1047_p3 }
  0x55   : > { %1057 = shalt.err (!%p1054_p8)
}
  0x56   : > { %898 = dma.hbm_to_vmem [thread:$0]  (!%p1286_p11), %s1284_s23, 128, %s281_s10, %s270_s13  }
  0x57   : > { %p1442_p13 = scmp.ne.s32.totalorder %s1435_s9, 0 }
  0x58   : > { %s1307_s15 = sand.u32 (!%p1442_p13), 1, %s1122_s25   ;;  %p1443_p10 = scmp.ne.s32.totalorder (!%p1442_p13), %s1433_s30, 0 }
  0x59   : > { %289 = sbr.rel (%p1442_p13) target bundleno = 727 (0x2d7), region = 48  ;;  %s736_s12 = sshll.u32 (!%p1442_p13), %s1307_s15, 3 }
  0x5a   : > { %s292_s1 = scalar_lea.sflag (!%p1442_p13), [#allocation3], %s1307_s15  ;;  %s295_s3 = scalar_lea.vmem (!%p1442_p13), [#allocation2], %s736_s12 }
  0x5e   : > { %1101 = dma.done.wait (%p1443_p10), %s292_s1, 128  }
  0x5f   : > { %1103 = vsyncadd (%p1443_p10), %s292_s1, 4294967168  ;;  %p1444_p8 = scmp.eq.s32.totalorder %s1202_s28, 0 }
  0x61   : > { %1105 = dma.done.wait (%p1444_p8), [#allocation6], 2560   ;;  %p1445_p11 = pmov %p1444_p8 }
  0x62   : > { %p1446_p1 = pmov %p1444_p8 }
  0x63   : > { %1107 = vsyncadd (%p1445_p11), [#allocation6], 4294964736 }
  0x64   : > { %1109 = dma.done.wait (%p1446_p1), [#allocation9], 2048   ;;  %p1447_p2 = pmov %p1446_p1 }
  0x65   : > { %v1138_v0 = vmov 0.0   ;;  %vm1139_vm0 = vmmov 0   ;;  %v342_v1 = vld [vmem:[#allocation5 + $0x18] sm:$0xff]  ;;  %v341_v2 = vld [vmem:[#allocation5 + $0x10] sm:$0xff]  ;;  %v340_v4 = vld [vmem:[#allocation5 + $0x8] sm:$0xff]  ;;  %vm350_vm1 = vcmask 261120  }
  0x66   : > { %1111 = vsyncadd (%p1447_p2), [#allocation9], 4294965248  ;;  %788 = vmatprep.subr.mxu0 %v1138_v0  ;;  %796 = vmatprep.mubr.msk.f32.mxu0 %vm1139_vm0, %v1138_v0  ;;  %v440_v3 = vld [vmem:[#allocation7 + $0x78] sm:$0xff]  ;;  %v439_v5 = vld [vmem:[#allocation7 + $0x70] sm:$0xff]  ;;  %s746_s22 = sshll.u32 %s1202_s28, 7  ;;  %s337_s18 = scalar_lea.vmem [#allocation10], %s736_s12 }
  0x67   : > { %799 = vmatprep.subr.mxu1 %v1138_v0  ;;  %831 = vmatprep.mubr.msk.f32.mxu1 %vm1139_vm0, %v1138_v0  ;;  %v438_v6 = vld [vmem:[#allocation7 + $0x68] sm:$0xff]  ;;  %v339_v7 = vld [vmem:[#allocation5] sm:$0xff]  ;;  %v338_v8 = vld [vmem:[%s295_s3] sm:$0xff]  ;;  %s628_s19 = sshll.u32 %s337_s18, 4  ;;  %s1382_s21 = scalar_lea.hbm %s1426_s7, %s746_s22  ;;  %s629_s19 = int_to_ptr.vmem [resolvable:$true] %s628_s19 }
  0x68   : > { %789 = vmatpush3.msra.mxu0 %v342_v1  ;;  %800 = vmatpush3.msra.mxu1 %v440_v3  ;;  %v437_v9 = vld [vmem:[#allocation7 + $0x60] sm:$0xff]  ;;  %v436_v10 = vld [vmem:[#allocation7 + $0x58] sm:$0xff]  ;;  %v435_v11 = vld [vmem:[#allocation7 + $0x50] sm:$0xff]  ;;  %s615_s1 = scalar_lea.sflag [#allocation4], %s1307_s15  ;;  %s1058_s3 = scalar_lea.vmem %s629_s19, 128 }
  0x69   : > { %790 = vmatprep.subr.mxu0 %v1138_v0  ;;  %801 = vmatprep.subr.mxu1 %v1138_v0  ;;  %v434_v12 = vld [vmem:[#allocation7 + $0x48] sm:$0xff]  ;;  %v433_v13 = vld [vmem:[#allocation7 + $0x40] sm:$0xff]  ;;  %v432_v14 = vld [vmem:[#allocation7 + $0x38] sm:$0xff]  ;;  %p1059_p4 = scmp.ne.s32.totalorder %s629_s19, %s1058_s3  ;;  %p1448_p6 = scmp.ne.s32.totalorder %s1440_s20, 0 }
  0x6a   : > { %791 = vmatpush3.msra.mxu0 %v341_v2  ;;  %802 = vmatpush3.msra.mxu1 %v439_v5  ;;  %v431_v15 = vld [vmem:[#allocation7 + $0x30] sm:$0xff]  ;;  %v430_v16 = vld [vmem:[#allocation7 + $0x28] sm:$0xff]  ;;  %v429_v17 = vld [vmem:[#allocation7 + $0x20] sm:$0xff]  ;;  %s1140_s30 = smov [#allocation10]  }
  0x6b   : > { %792 = vmatprep.subr.mxu0 %v1138_v0  ;;  %803 = vmatprep.subr.mxu1 %v1138_v0  ;;  %v428_v18 = vld [vmem:[#allocation7 + $0x18] sm:$0xff]  ;;  %v427_v19 = vld [vmem:[#allocation7 + $0x10] sm:$0xff]  ;;  %v426_v20 = vld [vmem:[#allocation7 + $0x8] sm:$0xff]  ;;  %p1060_p12 = pnand %p1059_p4, %p1448_p6  ;;  %s1062_s9 = sshll.u32 %s1140_s30, 4  ;;  %s1063_s9 = int_to_ptr.vmem [resolvable:$false] %s1062_s9 }
  0x6c   : > { %793 = vmatpush3.msra.mxu0 %v340_v4  ;;  %804 = vmatpush3.msra.mxu1 %v438_v6  ;;  %v425_v21 = vld [vmem:[#allocation7] sm:$0xff]  ;;  %v534_v22 = vld [vmem:[#allocation8 + $0x78] sm:$0xff]  ;;  %v533_v23 = vld [vmem:[#allocation8 + $0x70] sm:$0xff]  ;;  %s1064_s28 = scalar_lea.vmem %s1063_s9, 256  ;;  %p1065_p5 = scmp.lt.s32.totalorder %s629_s19, %s1063_s9 }
  0x6d   : > { %794 = vmatprep.subr.mxu0 %v1138_v0  ;;  %805 = vmatprep.subr.mxu1 %v1138_v0  ;;  %v532_v24 = vld [vmem:[#allocation8 + $0x68] sm:$0xff]  ;;  %v531_v25 = vld [vmem:[#allocation8 + $0x60] sm:$0xff]  ;;  %v530_v26 = vld [vmem:[#allocation8 + $0x58] sm:$0xff]  ;;  %p1061_p0 = pneg %p1060_p12  ;;  %p1066_p3 = scmp.lt.s32.totalorder %s1064_s28, %s1058_s3 }
  0x6e   : > { %795 = vmatpush3.msra.mxu0 %v339_v7  ;;  %806 = vmatpush3.msra.mxu1 %v437_v9  ;;  %v529_v27 = vld [vmem:[#allocation8 + $0x50] sm:$0xff]  ;;  %v528_v28 = vld [vmem:[#allocation8 + $0x48] sm:$0xff]  ;;  %v527_v29 = vld [vmem:[#allocation8 + $0x40] sm:$0xff] }
  0x6f   : > { %797 = vmatmul.mubr.msk.f32.vlgmr.msra.gmra.mxu0 %vm350_vm1, %v338_v8  ;;  %807 = vmatprep.subr.mxu1 %v1138_v0  ;;  %v526_v30 = vld [vmem:[#allocation8 + $0x38] sm:$0xff]  ;;  %v525_v31 = vld [vmem:[#allocation8 + $0x30] sm:$0xff]  ;;  %v524_v32 = vld [vmem:[#allocation8 + $0x28] sm:$0xff]  ;;  %p1067_p7 = por %p1066_p3, %p1065_p5 }
  0x70   : > { %834 = vmatprep.subr.mxu0 %v1138_v0  ;;  %808 = vmatpush3.msra.mxu1 %v436_v10  ;;  %v523_v33 = vld [vmem:[#allocation8 + $0x20] sm:$0xff]  ;;  %v522_v34 = vld [vmem:[#allocation8 + $0x18] sm:$0xff]  ;;  %v741_v35 = vld [vmem:[%s1421_s2] ss:$0 sm:$0xff] }
  0x71   : > { %866 = vmatprep.mubr.msk.f32.mxu0 %vm1139_vm0, %v1138_v0  ;;  %809 = vmatprep.subr.mxu1 %v1138_v0  ;;  %v521_v40 = vld [vmem:[#allocation8 + $0x10] sm:$0xff]  ;;  %v520_v41 = vld [vmem:[#allocation8 + $0x8] sm:$0xff]  ;;  %v519_v42 = vld [vmem:[#allocation8] sm:$0xff]  ;;  %p1068_p9 = pnand %p1067_p7, %p1061_p0 }
  0x72   : > { %810 = vmatpush3.msra.mxu1 %v435_v11  ;;  %835 = vmatpush3.msra.mxu0 %v534_v22  ;;  %v743_v43 = vld [vmem:[%s1423_s4] ss:$0 sm:$0xff] }
  0x73   : > { %811 = vmatprep.subr.mxu1 %v1138_v0  ;;  %836 = vmatprep.subr.mxu0 %v1138_v0  ;;  %v744_v48 = vld [vmem:[%s1425_s6] ss:$0 sm:$0xff] }
  0x74   : > { %812 = vmatpush3.msra.mxu1 %v434_v12  ;;  %837 = vmatpush3.msra.mxu0 %v533_v23 }
  0x75   : > { %813 = vmatprep.subr.mxu1 %v1138_v0  ;;  %838 = vmatprep.subr.mxu0 %v1138_v0 }
  0x76   : > { %814 = vmatpush3.msra.mxu1 %v433_v13  ;;  %839 = vmatpush3.msra.mxu0 %v532_v24 }
  0x77   : > { %815 = vmatprep.subr.mxu1 %v1138_v0  ;;  %840 = vmatprep.subr.mxu0 %v1138_v0 }
  0x78   : > { %816 = vmatpush3.msra.mxu1 %v432_v14  ;;  %841 = vmatpush3.msra.mxu0 %v531_v25 }
  0x79   : > { %817 = vmatprep.subr.mxu1 %v1138_v0  ;;  %842 = vmatprep.subr.mxu0 %v1138_v0 }
  0x7a   : > { %818 = vmatpush3.msra.mxu1 %v431_v15  ;;  %843 = vmatpush3.msra.mxu0 %v530_v26 }
  0x7b   : > { %819 = vmatprep.subr.mxu1 %v1138_v0  ;;  %844 = vmatprep.subr.mxu0 %v1138_v0 }
  0x7c   : > { %820 = vmatpush3.msra.mxu1 %v430_v16  ;;  %845 = vmatpush3.msra.mxu0 %v529_v27 }
  0x7d   : > { %821 = vmatprep.subr.mxu1 %v1138_v0  ;;  %846 = vmatprep.subr.mxu0 %v1138_v0 }
  0x7e   : > { %822 = vmatpush3.msra.mxu1 %v429_v17  ;;  %847 = vmatpush3.msra.mxu0 %v528_v28 }
  0x7f   : > { %823 = vmatprep.subr.mxu1 %v1138_v0  ;;  %848 = vmatprep.subr.mxu0 %v1138_v0 }
  0x80   : > { %824 = vmatpush3.msra.mxu1 %v428_v18  ;;  %849 = vmatpush3.msra.mxu0 %v527_v29 }
  0x81   : > { %825 = vmatprep.subr.mxu1 %v1138_v0  ;;  %850 = vmatprep.subr.mxu0 %v1138_v0 }
  0x82   : > { %826 = vmatpush3.msra.mxu1 %v427_v19  ;;  %851 = vmatpush3.msra.mxu0 %v526_v30 }
  0x83   : > { %827 = vmatprep.subr.mxu1 %v1138_v0  ;;  %852 = vmatprep.subr.mxu0 %v1138_v0 }
  0x84   : > { %828 = vmatpush3.msra.mxu1 %v426_v20  ;;  %853 = vmatpush3.msra.mxu0 %v525_v31 }
  0x85   : > { %829 = vmatprep.subr.mxu1 %v1138_v0  ;;  %854 = vmatprep.subr.mxu0 %v1138_v0 }
  0x86   : > { %830 = vmatpush3.msra.mxu1 %v425_v21  ;;  %855 = vmatpush3.msra.mxu0 %v524_v32 }
  0x87   : > { %856 = vmatprep.subr.mxu0 %v1138_v0 }
  0x88   : > { %857 = vmatpush3.msra.mxu0 %v523_v33 }
  0x89   : > { %858 = vmatprep.subr.mxu0 %v1138_v0 }
  0x8a   : > { %859 = vmatpush3.msra.mxu0 %v522_v34 }
  0x8b   : > { %860 = vmatprep.subr.mxu0 %v1138_v0 }
  0x8c   : > { %861 = vmatpush3.msra.mxu0 %v521_v40 }
  0x8d   : > { %862 = vmatprep.subr.mxu0 %v1138_v0 }
  0x8e   : > { %863 = vmatpush3.msra.mxu0 %v520_v41 }
  0x8f   : > { %864 = vmatprep.subr.mxu0 %v1138_v0 }
  0x90   : > { %865 = vmatpush3.msra.mxu0 %v519_v42 }
 0x12f   : > { %v420_v36 = vpop.f32.mrf.mxu0 }
 0x130   : > { %v421_v37 = vadd.f32 %v741_v35, %v420_v36 }
 0x131   : > { %v798_v38 = vpop.f32.mrf.mxu0 }
 0x132   : > { %v424_v39 = vmax.f32 %v421_v37, 0.0 }
 0x134   : > { %832 = vmatmul.mubr.f32.vlgmr.msra.gmra.mxu1 %v424_v39 }
 0x1f4   : > { %v514_v44 = vpop.f32.mrf.mxu1 }
 0x1f5   : > { %v515_v45 = vadd.f32 %v743_v43, %v514_v44 }
 0x1f6   : > { %v833_v46 = vpop.f32.mrf.mxu1 }
 0x1f7   : > { %v518_v47 = vmax.f32 %v515_v45, 0.0 }
 0x1f9   : > { %867 = vmatmul.mubr.f32.vlgmr.msra.gmra.mxu0 %v518_v47 }
 0x2b9   : > { %v608_v49 = vpop.f32.mrf.mxu0 }
 0x2ba   : > { %v609_v50 = vadd.f32 %v744_v48, %v608_v49 }
 0x2bb   : > { %v868_v51 = vpop.f32.mrf.mxu0 }
 0x2bc   : > { %950 = vtanh.f32 %v609_v50 }
 0x2c9   : > { %v951_v52 = vpop.eup %950 }
 0x2ca   : > { %613 = vst [vmem:[%s337_s18] sm:$0xff] %v951_v52 }
 0x2cb   : > { %1071 = shalt.err (!%p1068_p9)
}
 0x2cc   : > { %s1072_s12 = scalar_lea.hbm %s1382_s21, 128  ;;  %s1076_s10 = scalar_lea.hbm %s1426_s7, 256 }
 0x2cd   : > { %p1073_p13 = scmp.ne.s32.totalorder %s1382_s21, %s1072_s12  ;;  %p1077_p11 = scmp.lt.s32.totalorder %s1382_s21, %s1426_s7 }
 0x2ce   : > { %p1078_p1 = scmp.lt.s32.totalorder %s1076_s10, %s1072_s12 }
 0x2cf   : > { %p1074_p10 = pnand %p1073_p13, %p1448_p6 }
 0x2d0   : > { %p1079_p2 = por %p1078_p1, %p1077_p11 }
 0x2d1   : > { %p1075_p8 = pneg %p1074_p10 }
 0x2d3   : > { %p1080_p4 = pnand %p1079_p2, %p1075_p8 }
 0x2d5   : > { %1083 = shalt.err (!%p1080_p4)
}
 0x2d6   : > { %883 = dma.vmem_to_hbm [thread:$0]  (%p1448_p6), %s629_s19, 128, %s1382_s21, %s615_s1  }
 0x2d7 PF: > { %s640_s22 = sand.u32 1, %s1118_s24   ;;  %p1449_p12 = scmp.ne.s32.totalorder %s1434_s8, 0 }
 0x2d8   : > { %p1450_p0 = scmp.ge.s32.totalorder %s1130_s27, 2  ;;  %s641_s18 = scalar_lea.sflag [#allocation4], %s640_s22 }
 0x2da   : > { %p900_p5 = pnand %p1450_p0, %p1449_p12 }
 0x2dc   : > { %p901_p3 = pneg %p900_p5 }
 0x2de   : > { %1113 = dma.done.wait (%p901_p3), %s641_s18, 128  }
 0x2df   : > { %1115 = vsyncadd (%p901_p3), %s641_s18, 4294967168  ;;  %p22_p7 = scmp.ge.s32.totalorder %s1261_s14, 4   ;;  %s1451_s24 = smov %s1122_s25 }
 0x2e0   : > { %s1452_s25 = smov %s1126_s26  ;;  %s1453_s26 = smov %s1271_s17 }
 0x2e1   : > { %s1454_s27 = smov %s1261_s14  ;;  %24 = sbr.rel (!%p22_p7) target bundleno = 10 (0xa), region = 105 }
 0x2e6   :  { %646 = vsyncpa [#allocation3], 1 }
 0x2e7   :  { %648 = vsyncpa [#allocation3 + $0x1], 1 }
 0x2e8   :  { %649 = vsyncpa [#allocation6], 1 }
 0x2e9   :  { %650 = vsyncpa [#allocation9], 1 }
 0x2ea   :  { %651 = vsyncpa [#allocation4], 1 }
 0x2eb   :  { %653 = vsyncpa [#allocation4 + $0x1], 1 }

</bundles_post_ra>
